<compile_context>
chip_gen: v6e
topology: v6e:2x2x1
jax: 0.10.0
libtpu: 0.0.40
codegen_flags: <defaults>
</compile_context>

<pallas_src>
import functools

import jax
import jax.numpy as jnp
import numpy as np
from jax.experimental import pallas as pl
from jax.experimental.pallas import tpu as pltpu


_NEG_BIG = -1e30
_PAD_BATCH = -(1 << 30)  # never equals any valid (non-negative) graph id


def _round_up(x, m):
    return ((x + m - 1) // m) * m


# --------------------------------------------------------------------------- #
# Pass 1: per-graph node count and max value (segment reductions over N tiles) #
# --------------------------------------------------------------------------- #
def _stats_kernel(values_ref, batch_ref, cnt_ref, max_ref, *, n_graphs):
    t = pl.program_id(0)
    vals = values_ref[...]                        # (1, TN) f32
    batch = batch_ref[...]                        # (1, TN) i32
    gp = cnt_ref.shape[0]

    # Row k corresponds to graph id (G-1-k): flipped-unique ordering.
    gid = (n_graphs - 1) - jax.lax.broadcasted_iota(jnp.int32, (gp, 1), 0)
    member = batch == gid                         # (Gp, TN) bool via broadcast

    @pl.when(t == 0)
    def _init():
        cnt_ref[...] = jnp.zeros_like(cnt_ref)
        max_ref[...] = jnp.full_like(max_ref, _NEG_BIG)

    # Segment count: lane reduce of the 0/1 mask (exact in f32, XLU has slack).
    cnt_ref[...] += jnp.sum(member.astype(jnp.float32), axis=1, keepdims=True)
    vmask = jnp.where(member, vals, jnp.float32(_NEG_BIG))          # (Gp, TN)
    max_ref[...] = jnp.maximum(max_ref[...],
                               jnp.max(vmask, axis=1, keepdims=True))


# --------------------------------------------------------------------------- #
# Pass 2: eps-greedy probs + masked Categorical sample (Gumbel-max) per graph  #
# --------------------------------------------------------------------------- #
def _sample_kernel(cnt_ref, max_ref, values_ref, batch_ref, gumbel_ref,
                   probs_ref, actions_ref, bscore_ref, barg_ref,
                   *, n_graphs, eps):
    t = pl.program_id(0)
    n_t = pl.num_programs(0)

    vals = values_ref[...]                        # (1, TN) f32
    batch = batch_ref[...]                        # (1, TN) i32
    gumbel = gumbel_ref[...]                      # (1, TN) f32
    cnt = cnt_ref[...]                            # (Gp, 1) f32
    vmax = max_ref[...]                           # (Gp, 1) f32
    gp = cnt.shape[0]
    tn = vals.shape[1]

    @pl.when(t == 0)
    def _init():
        bscore_ref[...] = jnp.full_like(bscore_ref, _NEG_BIG)
        barg_ref[...] = jnp.full_like(barg_ref, -1)

    gid = (n_graphs - 1) - jax.lax.broadcasted_iota(jnp.int32, (gp, 1), 0)
    member = batch == gid                         # (Gp, TN) bool via broadcast

    # Per-graph scalars (O(Gp) EUP work): eps term and its logs.  addc == 0 for
    # count <= 1 also reproduces the count==1 -> prob 1.0 fixup exactly.
    addc = jnp.where(cnt > 1.0, jnp.float32(eps) / (cnt - 1.0), jnp.float32(0.0))
    log_addc = jnp.where(addc > 0.0, jnp.log(addc), jnp.float32(_NEG_BIG))
    log1p_addc = jnp.log1p(addc)

    # Exact f32 equality against the per-graph max (max was computed from the
    # same values, so equality is exact).
    is_max = jnp.logical_and(member, vals == vmax)                   # (Gp, TN)

    # probs: 1+addc on argmax nodes, addc on other member nodes, 0 elsewhere.
    probs_gn = jnp.where(is_max, 1.0 + addc,
                         jnp.where(member, addc, jnp.float32(0.0)))  # (Gp, TN)
    # Scatter back to nodes: each column has at most one nonzero row.
    probs_ref[...] = jnp.sum(probs_gn, axis=0, keepdims=True)        # (1, TN)

    # Gumbel-max == Categorical(probs * mask).sample() per graph row; log(prob)
    # is taken from the precomputed (Gp,1) scalars (no full-block transcendental).
    logp = jnp.where(is_max, log1p_addc, log_addc)                   # (Gp, TN)
    score = jnp.where(member, logp + gumbel, jnp.float32(_NEG_BIG))  # (Gp, TN)

    tile_best = jnp.max(score, axis=1, keepdims=True)                # (Gp, 1)
    lane = jax.lax.broadcasted_iota(jnp.int32, (1, tn), 1) + t * tn  # (1, TN)
    tile_arg = jnp.min(jnp.where(score == tile_best, lane, jnp.int32(1 << 30)),
                       axis=1, keepdims=True)                        # (Gp, 1)

    old_best = bscore_ref[...]
    better = tile_best > old_best
    barg_ref[...] = jnp.where(better, tile_arg, barg_ref[...])
    bscore_ref[...] = jnp.maximum(old_best, tile_best)

    @pl.when(t == n_t - 1)
    def _emit():
        # Empty (or padded) graphs get -1 instead of a bogus node index.
        actions_ref[...] = jnp.where(cnt > 0.0, barg_ref[...], jnp.int32(-1))


# --------------------------------------------------------------------------- #
# Host wrapper                                                                 #
# --------------------------------------------------------------------------- #
def gaqn_actor_select_action(values, batch_idx, num_graphs, eps_greed,
                             seed=0, lane_tile=None):
    """values: (N,) node Q-values; batch_idx: (N,) graph ids in [0, G); returns
    (probs (N,), shifted_actions (G,)) with actions ordered by descending graph
    id (flipped unique), matching GAQN_Actor.select_action(return_shifted=True)."""
    N = int(values.shape[0])
    G = int(num_graphs)
    Gp = _round_up(max(G, 1), 8)

    if lane_tile is None:
        # Target Gp*TN ~= 32K elements: keeps the (Gp,TN) per-tile working set
        # near vreg capacity (no spill cliff for large G, few grid steps for
        # small G) and bounds VMEM on every generation including v7x (64 MiB).
        lane_tile = max(128, (32768 // Gp) // 128 * 128)
    TN = _round_up(min(int(lane_tile), _round_up(max(N, 1), 128)), 128)
    Np = _round_up(max(N, 1), TN)
    nT = Np // TN

    vals_p = jnp.pad(values.astype(jnp.float32), (0, Np - N)).reshape(1, Np)
    batch_p = jnp.pad(batch_idx.astype(jnp.int32), (0, Np - N),
                      constant_values=_PAD_BATCH).reshape(1, Np)
    # Per-node Gumbel(0,1) noise (generated outside the kernel: no TPU-only PRNG
    # primitives, so the kernel also runs under interpret mode).
    # TODO(synk): torch uses its own RNG stream for Categorical.sample(); this is
    # distributionally equivalent (Gumbel-max) but a different random stream.
    gumbel_p = jax.random.gumbel(jax.random.PRNGKey(seed), (1, Np),
                                 dtype=jnp.float32)

    cparams = pltpu.CompilerParams(dimension_semantics=("arbitrary",))

    # Pass 1: per-graph count & max over N tiles (resident (Gp,1) accumulators).
    cnt_g, max_g = pl.pallas_call(
        functools.partial(_stats_kernel, n_graphs=G),
        out_shape=(jax.ShapeDtypeStruct((Gp, 1), jnp.float32),
                   jax.ShapeDtypeStruct((Gp, 1), jnp.float32)),
        grid=(nT,),
        in_specs=[pl.BlockSpec((1, TN), lambda t: (0, t)),
                  pl.BlockSpec((1, TN), lambda t: (0, t))],
        out_specs=(pl.BlockSpec((Gp, 1), lambda t: (0, 0)),
                   pl.BlockSpec((Gp, 1), lambda t: (0, 0))),
        compiler_params=cparams,
    )(vals_p, batch_p)

    # Pass 2: probs + Gumbel-max sample, tiled over N, running best in scratch.
    probs_p, actions_p = pl.pallas_call(
        functools.partial(_sample_kernel, n_graphs=G, eps=float(eps_greed)),
        out_shape=(jax.ShapeDtypeStruct((1, Np), jnp.float32),
                   jax.ShapeDtypeStruct((Gp, 1), jnp.int32)),
        grid=(nT,),
        in_specs=[pl.BlockSpec((Gp, 1), lambda t: (0, 0)),
                  pl.BlockSpec((Gp, 1), lambda t: (0, 0)),
                  pl.BlockSpec((1, TN), lambda t: (0, t)),
                  pl.BlockSpec((1, TN), lambda t: (0, t)),
                  pl.BlockSpec((1, TN), lambda t: (0, t))],
        out_specs=(pl.BlockSpec((1, TN), lambda t: (0, t)),
                   pl.BlockSpec((Gp, 1), lambda t: (0, 0))),
        scratch_shapes=[pltpu.VMEM((Gp, 1), jnp.float32),
                        pltpu.VMEM((Gp, 1), jnp.int32)],
        compiler_params=cparams,
    )(cnt_g, max_g, vals_p, batch_p, gumbel_p)

    probs = probs_p.reshape(Np)[:N]
    actions = actions_p.reshape(Gp)[:G]
    return probs, actions


# --------------------------------------------------------------------------- #
# Self-test                                                                    #
# --------------------------------------------------------------------------- #
def _check(values, batch_idx, G, eps_greed, probs, actions):
    v = np.asarray(values)
    b = np.asarray(batch_idx)
    N = v.shape[0]
    ref = np.zeros(N, np.float32)
    for g in range(G):
        m = b == g
        cnt = int(m.sum())
        mx = v[m].max()
        pr = (v[m] == mx).astype(np.float32)
        if cnt > 1:
            pr = pr + np.float32(eps_greed) / np.float32(cnt - 1)
        else:
            pr[:] = 1.0
        ref[m] = pr
    assert np.allclose(np.asarray(probs), ref, atol=1e-6), (probs, ref)

    a = np.asarray(actions)
    assert a.shape == (G,)
    for k in range(G):
        g = G - 1 - k  # flipped-unique ordering (descending graph id)
        assert 0 <= a[k] < N, (k, a[k])
        assert b[a[k]] == g, (k, a[k], b[a[k]], g)


if __name__ == "__main__":
    key = jax.random.PRNGKey(0)
    k1, k2 = jax.random.split(key)
    eps_greed = 0.05  # GAQN_Actor(eps_greed)

    # Test 1: small graph batch (3 graphs, 16 nodes), single lane tile.
    N1, G1 = 16, 3
    batch1 = jnp.array([0] * 5 + [1] * 6 + [2] * 5, dtype=jnp.int32)
    values1 = jax.random.normal(k1, (N1,), dtype=jnp.float32)
    probs1, actions1 = gaqn_actor_select_action(values1, batch1, G1, eps_greed, seed=0)
    jax.block_until_ready((probs1, actions1))
    _check(values1, batch1, G1, eps_greed, probs1, actions1)

    # Test 2: multi-tile path (5 graphs, 300 nodes, 128-lane tiles -> 3 tiles,
    # padded node tail and padded graph rows exercised).
    N2, G2 = 300, 5
    batch2 = jnp.repeat(jnp.arange(G2, dtype=jnp.int32), N2 // G2)
    values2 = jax.random.normal(k2, (N2,), dtype=jnp.float32)
    probs2, actions2 = gaqn_actor_select_action(values2, batch2, G2, eps_greed,
                                                seed=123, lane_tile=128)
    jax.block_until_ready((probs2, actions2))
    _check(values2, batch2, G2, eps_greed, probs2, actions2)

    print("KERNEL_OK")
</pallas_src>

<mosaic_0001>
module attributes {stable_mosaic.version = 11 : i64} {
  func.func @_stats_kernel(%arg0: i32, %arg1: memref<1x128xf32, #tpu.memory_space<vmem>>, %arg2: memref<1x128xi32, #tpu.memory_space<vmem>>, %arg3: memref<8x1xf32, #tpu.memory_space<vmem>>, %arg4: memref<8x1xf32, #tpu.memory_space<vmem>>) attributes {dimension_semantics = [#tpu.dimension_semantics<arbitrary>], iteration_bounds = array<i64: 1>, scalar_prefetch = 0 : i64, scratch_operands = 0 : i64, tpu.core_type = #tpu.core_type<tc>, window_params = [{transform_indices = @transform_0, window_bounds = array<i64: 1, 128>}, {transform_indices = @transform_1, window_bounds = array<i64: 1, 128>}, {pipeline_mode = #tpu.pipeline_mode<synchronous>, transform_indices = @transform_2, window_bounds = array<i64: 8, 1>}, {pipeline_mode = #tpu.pipeline_mode<synchronous>, transform_indices = @transform_3, window_bounds = array<i64: 8, 1>}]} {
    %c0 = arith.constant 0 : index
    %c0_0 = arith.constant 0 : index
    %0 = vector.load %arg1[%c0, %c0_0] : memref<1x128xf32, #tpu.memory_space<vmem>>, vector<1x128xf32>
    %c0_1 = arith.constant 0 : index
    %c0_2 = arith.constant 0 : index
    %1 = vector.load %arg2[%c0_1, %c0_2] : memref<1x128xi32, #tpu.memory_space<vmem>>, vector<1x128xi32>
    %2 = tpu.iota {dimensions = array<i32: 0>} : vector<8x1xi32>
    %c2_i32 = arith.constant 2 : i32
    %3 = vector.broadcast %c2_i32 : i32 to vector<8x1xi32>
    %4 = arith.subi %3, %2 : vector<8x1xi32>
    %5 = vector.broadcast %1 : vector<1x128xi32> to vector<8x128xi32>
    %6 = vector.broadcast %4 : vector<8x1xi32> to vector<8x128xi32>
    %7 = arith.cmpi eq, %5, %6 : vector<8x128xi32>
    %c0_i32 = arith.constant 0 : i32
    %8 = arith.cmpi eq, %arg0, %c0_i32 : i32
    %9 = arith.extui %8 : i1 to i32
    %c0_i32_3 = arith.constant 0 : i32
    %10 = arith.cmpi ne, %9, %c0_i32_3 : i32
    scf.if %10 {
      %cst_14 = arith.constant 0.000000e+00 : f32
      %27 = vector.broadcast %cst_14 : f32 to vector<8x1xf32>
      %c0_15 = arith.constant 0 : index
      %c0_16 = arith.constant 0 : index
      %28 = vector.load %arg3[%c0_15, %c0_16] : memref<8x1xf32, #tpu.memory_space<vmem>>, vector<8x1xf32>
      tpu.vector_store %arg3[%c0_15, %c0_16], %27 {strides = array<i32>} : memref<8x1xf32, #tpu.memory_space<vmem>>, vector<8x1xf32>,
      %cst_17 = arith.constant -1.000000e+30 : f32
      %29 = vector.broadcast %cst_17 : f32 to vector<8x1xf32>
      %c0_18 = arith.constant 0 : index
      %c0_19 = arith.constant 0 : index
      %30 = vector.load %arg4[%c0_18, %c0_19] : memref<8x1xf32, #tpu.memory_space<vmem>>, vector<8x1xf32>
      tpu.vector_store %arg4[%c0_18, %c0_19], %29 {strides = array<i32>} : memref<8x1xf32, #tpu.memory_space<vmem>>, vector<8x1xf32>,
    } else {
    }
    %c0_4 = arith.constant 0 : index
    %c0_5 = arith.constant 0 : index
    %11 = vector.load %arg3[%c0_4, %c0_5] : memref<8x1xf32, #tpu.memory_space<vmem>>, vector<8x1xf32>
    %12 = arith.extui %7 : vector<8x128xi1> to vector<8x128xi32>
    %13 = arith.sitofp %12 : vector<8x128xi32> to vector<8x128xf32>
    %cst = arith.constant dense<0.000000e+00> : vector<8xf32>
    %14 = vector.multi_reduction <add>, %13, %cst [1] : vector<8x128xf32> to vector<8xf32>
    %15 = vector.shape_cast %14 : vector<8xf32> to vector<8x1xf32>
    %16 = arith.addf %11, %15 : vector<8x1xf32>
    %c0_6 = arith.constant 0 : index
    %c0_7 = arith.constant 0 : index
    %17 = vector.load %arg3[%c0_6, %c0_7] : memref<8x1xf32, #tpu.memory_space<vmem>>, vector<8x1xf32>
    tpu.vector_store %arg3[%c0_6, %c0_7], %16 {strides = array<i32>} : memref<8x1xf32, #tpu.memory_space<vmem>>, vector<8x1xf32>,
    %cst_8 = arith.constant -1.000000e+30 : f32
    %18 = vector.shape_cast %0 : vector<1x128xf32> to vector<1x128xf32>
    %19 = vector.broadcast %18 : vector<1x128xf32> to vector<8x128xf32>
    %20 = vector.broadcast %cst_8 : f32 to vector<8x128xf32>
    %21 = arith.select %7, %19, %20 : vector<8x128xi1>, vector<8x128xf32>
    %c0_9 = arith.constant 0 : index
    %c0_10 = arith.constant 0 : index
    %22 = vector.load %arg4[%c0_9, %c0_10] : memref<8x1xf32, #tpu.memory_space<vmem>>, vector<8x1xf32>
    %cst_11 = arith.constant dense<0xFF800000> : vector<8xf32>
    %23 = vector.multi_reduction <maximumf>, %21, %cst_11 [1] : vector<8x128xf32> to vector<8xf32>
    %24 = vector.shape_cast %23 : vector<8xf32> to vector<8x1xf32>
    %25 = arith.maximumf %22, %24 : vector<8x1xf32>
    %c0_12 = arith.constant 0 : index
    %c0_13 = arith.constant 0 : index
    %26 = vector.load %arg4[%c0_12, %c0_13] : memref<8x1xf32, #tpu.memory_space<vmem>>, vector<8x1xf32>
    tpu.vector_store %arg4[%c0_12, %c0_13], %25 {strides = array<i32>} : memref<8x1xf32, #tpu.memory_space<vmem>>, vector<8x1xf32>,
    return
  }
  func.func @transform_0(%arg0: i32) -> (i32, i32) {
    %c0_i32 = arith.constant 0 : i32
    %c0_i32_0 = arith.constant 0 : i32
    return %c0_i32, %arg0 : i32, i32
  }
  func.func @transform_1(%arg0: i32) -> (i32, i32) {
    %c0_i32 = arith.constant 0 : i32
    %c0_i32_0 = arith.constant 0 : i32
    return %c0_i32, %arg0 : i32, i32
  }
  func.func @transform_2(%arg0: i32) -> (i32, i32) {
    %c0_i32 = arith.constant 0 : i32
    %c0_i32_0 = arith.constant 0 : i32
    %c0_i32_1 = arith.constant 0 : i32
    return %c0_i32, %c0_i32_0 : i32, i32
  }
  func.func @transform_3(%arg0: i32) -> (i32, i32) {
    %c0_i32 = arith.constant 0 : i32
    %c0_i32_0 = arith.constant 0 : i32
    %c0_i32_1 = arith.constant 0 : i32
    return %c0_i32, %c0_i32_0 : i32, i32
  }
}

</mosaic_0001>

<bundles_post_ra>
// kernel: tpu_custom_call.1
= control target key start
LH: loop header
LB: loop body
LE: loop exit
PB: predicated region body
PF: predicated region fallthrough
CT: control target
= control target key end

     0   :  { %9 = vsyncpa [#allocation3], 0  ;;  %s99_s12 = smov [#allocation2]   ;;  %s150_s0 = inlined_call_operand.hbm [shape: f32[1,128], index: 0, kind: input, shape index: {}]   ;;  %s151_s1 = inlined_call_operand.vmem [shape: s32[1,128], index: 1, kind: input, shape index: {}]   ;;  %s152_s2 = inlined_call_operand.vmem [shape: f32[8,1], index: 2, kind: output, shape index: {0}]   ;;  %s153_s3 = inlined_call_operand.vmem [shape: f32[8,1], index: 3, kind: output, shape index: {1}]  }
   0x1   :  { %s16_s13 = sshll.u32 %s99_s12, 4  ;;  %s17_s13 = int_to_ptr.vmem [resolvable:$true] %s16_s13 }
   0x2   :  { %s85_s14 = scalar_lea.vmem %s17_s13, 16  ;;  %s89_s15 = scalar_lea.vmem %s17_s13, 32 }
   0x3   :  { %p86_p0 = scmp.ne.s32.totalorder %s17_s13, %s85_s14  ;;  %p90_p1 = scmp.lt.s32.totalorder %s17_s13, %s17_s13 }
   0x4   :  { %p91_p2 = scmp.lt.s32.totalorder %s89_s15, %s85_s14 }
   0x6   :  { %p92_p3 = por %p91_p2, %p90_p1 }
   0x8   :  { %p93_p4 = pnand %p92_p3, %p86_p0 }
   0xa   :  { %96 = shalt.err (!%p93_p4)
}
   0xb   :  { %19 = dma.hbm_to_vmem [thread:$0]  %s150_s0, 16, %s17_s13, [#allocation3]  }
   0xc   :  { %97 = dma.done.wait [#allocation3], 16  }
   0xd   :  { %98 = vsyncadd [#allocation3], 4294967280  ;;  %v27_v0 = vlaneseq  ;;  %vm39_vm0 = vcmask 7168   ;;  %v100_v1 = vmov 0.0   ;;  %v101_v2 = vmov -1e+30  }
   0xe   :  { %40 = vst.msk [vmem:[%s152_s2] sm:$0xff] %vm39_vm0, %v100_v1  ;;  %41 = vst.msk [vmem:[%s153_s3] sm:$0xff] %vm39_vm0, %v101_v2  ;;  %v71_v5 = vld [vmem:[%s151_s1] ss:$0 sm:$0xff] }
   0xf   :  { %v28_v3 = vshrl.u32 %v27_v0, 7  ;;  %v73_v6 = vld [vmem:[#allocation2] ss:$0 sm:$0xff] }
  0x11   :  { %v29_v4 = vsub.s32 2, %v28_v3 }
  0x13   :  { %vm34_vm1 = vcmp.eq.s32.totalorder %v71_v5, %v29_v4 }
  0x14   :  { %v72_v7 = vsel %vm34_vm1, 1.0, %v100_v1  ;;  %v56_v8 = vsel %vm34_vm1, %v73_v6, -1e+30 }
  0x15   :  { %45 = vadd.xlane.f32.xlu0 %v72_v7  ;;  %v42_v9 = vld [vmem:[%s152_s2] sm:$0xff] }
  0x16   :  { %v57_v12 = vld [vmem:[%s153_s3] sm:$0xff] }
  0x19   :  { %58 = vmax.xlane.f32.xlu0 %v56_v8 }
  0x9e   :  { %v46_v10 = vpop.xlane.xlu0 %45 }
  0x9f   :  { %v47_v11 = vadd.f32 %v46_v10, %v42_v9 }
  0xa1   :  { %49 = vst.msk [vmem:[%s152_s2] sm:$0xff] %vm39_vm0, %v47_v11 }
  0xa2   :  { %v59_v13 = vpop.xlane.xlu0 %58 }
  0xa3   :  { %v60_v14 = vmax.f32 %v57_v12, %v59_v13 }
  0xa5   :  { %61 = vst.msk [vmem:[%s153_s3] sm:$0xff] %vm39_vm0, %v60_v14 }
  0xa6   :  { %70 = vsyncpa [#allocation3], 1 }

</bundles_post_ra>
